<compile_context>
chip_gen: v6e
topology: v6e:2x2x1
jax: 0.10.0
libtpu: 0.0.40
codegen_flags: <defaults>
</compile_context>

<pallas_src>
import math
from functools import partial

import jax
import jax.numpy as jnp
from jax.experimental import pallas as pl
from jax.experimental.pallas import tpu as pltpu


def _splatflow_kernel(x_ref, c_t_ref, const_ref, w_fused_ref, o_ref, acc_ref,
                      *, matmul_dtype):
    # Grid: (batch, phase, s_tile).  phase 0 = accumulate splat_x, 1 = emit out.
    # x_ref:       (1, Ts, D)  token tile
    # c_t_ref:     (D, N)      centers^T pre-scaled by 1/scale^2
    # const_ref:   (3, N)      rows: [-0.5/s^2, -0.5*||c||^2/s^2, amplitude]
    # w_fused_ref: (D, D)      Wv^T @ Wo^T
    # o_ref:       (1, Ts, D)
    # acc_ref:     (N, D) f32  VMEM scratch: splat_x, then splat_mix
    p = pl.program_id(1)
    s = pl.program_id(2)
    ns = pl.num_programs(2)

    x = x_ref[0]                                   # (Ts, D)
    x_f32 = x.astype(jnp.float32)
    x_mm = x.astype(matmul_dtype)

    neg_half_inv_s2 = const_ref[0:1, :]            # (1, N)
    neg_half_csq = const_ref[1:2, :]               # (1, N)
    amp = const_ref[2:3, :]                        # (1, N)

    # ---- gaussian splat attention for this tile (recomputed in both passes) --
    # h = -0.5 * ||x - c||^2 / s^2 ; all scaling pre-folded into constants.
    xc = jnp.dot(x_mm, c_t_ref[...].astype(matmul_dtype),
                 preferred_element_type=jnp.float32)            # (Ts, N) = (x.c)/s^2
    x_sq = jnp.sum(x_f32 * x_f32, axis=-1, keepdims=True)       # (Ts, 1) f32
    h = x_sq * neg_half_inv_s2 + neg_half_csq + xc              # (Ts, N)
    h = jnp.minimum(h, 0.0)        # cancellation guard (== max(nd, 0))
    h = jnp.maximum(h, -12.5)      # == clamp(nd, max=25)
    g = jnp.exp(h) * amp                                         # (Ts, N)
    denom = jnp.maximum(jnp.sum(g, axis=-1, keepdims=True), 1e-8)
    attn = g * pl.reciprocal(denom, approx=True)                 # (Ts, N) f32
    attn_mm = attn.astype(matmul_dtype)

    @pl.when(p == 0)
    def _accumulate():
        @pl.when(s == 0)
        def _():
            acc_ref[...] = jnp.zeros_like(acc_ref)

        # splat_x[n, d] += sum_s attn[s, n] * x[s, d]
        acc_ref[...] += jax.lax.dot_general(
            attn_mm, x_mm, (((0,), (0,)), ((), ())),
            preferred_element_type=jnp.float32)                  # (N, D)

        @pl.when(s == ns - 1)
        def _():
            # Apply the fused value+output projection once per batch element.
            acc_ref[...] = jnp.dot(acc_ref[...].astype(matmul_dtype),
                                   w_fused_ref[...].astype(matmul_dtype),
                                   preferred_element_type=jnp.float32)

    @pl.when(p == 1)
    def _emit():
        out = jnp.dot(attn_mm, acc_ref[...].astype(matmul_dtype),
                      preferred_element_type=jnp.float32)        # (Ts, D)
        o_ref[0] = out.astype(o_ref.dtype)


def _device_kind():
    try:
        return jax.devices()[0].device_kind.lower()
    except Exception:
        return ""


def _vmem_limit_bytes():
    kind = _device_kind()
    if "v7" in kind:
        return 48 * 1024 * 1024          # 64 MiB physical per TC: leave headroom
    if any(v in kind for v in ("v4", "v5", "v6")):
        return 96 * 1024 * 1024          # 128 MiB physical
    return None                          # unknown chip: keep the default


def _pick_s_tile(S, D, itemsize, vmem_budget):
    # x tile + out tile, double-buffered each (4 tiles live); keep them well
    # under the budget so constants, the (N,D) accumulator and compiler
    # scratch fit comfortably.
    for t in (2048, 1024, 512, 256, 128, 64, 32, 16, 8):
        if t <= S and S % t == 0 and 4 * t * D * itemsize <= vmem_budget // 4:
            return t
    return S  # full-extent block (always legal); TODO(synk): pad ragged S.


def splatflow_attention(x, centers, log_scales, amplitudes, wv, wo, *,
                        s_tile=None, matmul_dtype=jnp.float32):
    """x: (B, S, D); centers: (N, D); log_scales, amplitudes: (N,);
    wv, wo: (D, D) nn.Linear weights (out, in).  matmul_dtype selects the MXU
    operand dtype (bf16 recommended at production D on v6e/v7x)."""
    B, S, D = x.shape
    N = centers.shape[0]
    itemsize = jnp.dtype(x.dtype).itemsize

    # --- wrapper-side constant folding (incl. the -0.5 of the gaussian) ------
    scales = jnp.clip(jnp.exp(log_scales), 0.1, 3.0)                # (N,)
    amps = jnp.clip(amplitudes, 0.1, 2.0)                           # (N,)
    inv_s2 = 1.0 / (scales * scales)                                # (N,)
    c_t = centers.T * inv_s2[None, :]                               # (D, N)
    consts = jnp.stack(
        [-0.5 * inv_s2,
         -0.5 * jnp.sum(centers * centers, axis=-1) * inv_s2,
         amps], axis=0)                                             # (3, N)
    w_fused = wv.T @ wo.T                                           # (D, D)

    # --- tiling / grid --------------------------------------------------------
    vmem_limit = _vmem_limit_bytes()
    if s_tile is None:
        s_tile = _pick_s_tile(S, D, itemsize,
                              vmem_limit if vmem_limit else 32 * 1024 * 1024)
    assert S % s_tile == 0, "S tile must divide S"
    num_s_tiles = S // s_tile
    grid = (B, 2, num_s_tiles)          # (batch, phase, seq tile)

    cost = pl.CostEstimate(
        flops=int(B * (8 * S * N * D + 2 * N * D * D)),
        transcendentals=int(2 * B * S * N),
        bytes_accessed=int(3 * B * S * D * itemsize            # x read x2 + out
                           + (D * N + 3 * N + D * D) * 4))     # constants

    kernel = partial(_splatflow_kernel, matmul_dtype=matmul_dtype)

    def build(single_buffer_consts):
        const_kw = {}
        if single_buffer_consts:
            # Constant index maps never change block -> double buffers are waste.
            const_kw = dict(pipeline_mode=pl.Buffered(1))
        in_specs = [
            pl.BlockSpec((1, s_tile, D), lambda b, p, s: (b, s, 0)),      # x tile
            pl.BlockSpec((D, N), lambda b, p, s: (0, 0), **const_kw),     # scaled centers^T
            pl.BlockSpec((3, N), lambda b, p, s: (0, 0), **const_kw),     # per-splat consts
            pl.BlockSpec((D, D), lambda b, p, s: (0, 0), **const_kw),     # Wv^T Wo^T
        ]
        # Phase 0 parks the output on block (b,0,0) (never flushed until it is
        # actually written in phase 1); phase 1 walks the S tiles.
        out_specs = pl.BlockSpec((1, s_tile, D), lambda b, p, s: (b, p * s, 0))
        cp_kwargs = dict(dimension_semantics=("parallel", "arbitrary", "arbitrary"))
        if vmem_limit is not None:
            cp_kwargs["vmem_limit_bytes"] = vmem_limit
        return pl.pallas_call(
            kernel,
            out_shape=jax.ShapeDtypeStruct((B, S, D), x.dtype),
            grid_spec=pltpu.PrefetchScalarGridSpec(
                num_scalar_prefetch=0,
                grid=grid,
                in_specs=in_specs,
                out_specs=out_specs,
                scratch_shapes=[pltpu.VMEM((N, D), jnp.float32)],  # splat_x / splat_mix
            ),
            compiler_params=pltpu.CompilerParams(**cp_kwargs),
            cost_estimate=cost,
        )

    try:
        return build(True)(x, c_t, consts, w_fused)
    except Exception:
        # This Pallas build rejected pipeline_mode=pl.Buffered(1); retry with
        # default (double-buffered) constant blocks.
        return build(False)(x, c_t, consts, w_fused)


def splatflow_attention_ref(x, centers, log_scales, amplitudes, wv, wo):
    """Pure-JAX reference mirroring the PyTorch forward (eval mode)."""
    scales = jnp.clip(jnp.exp(log_scales), 0.1, 3.0)
    amps = jnp.clip(amplitudes, 0.1, 2.0)
    diff = x[:, :, None, :] - centers[None, None, :, :]           # (B,S,N,D)
    d2 = jnp.sum(diff * diff, axis=-1)                            # (B,S,N)
    nd = jnp.minimum(d2 / (scales * scales)[None, None, :], 25.0)
    g = jnp.exp(-0.5 * nd) * amps[None, None, :]
    attn = g / jnp.maximum(jnp.sum(g, axis=-1, keepdims=True), 1e-8)
    values = x @ wv.T
    splat_reps = jnp.einsum('bsn,bsd->bnd', attn, values)
    token_out = jnp.einsum('bsn,bnd->bsd', attn, splat_reps)
    return token_out @ wo.T


if __name__ == "__main__":
    B, S, D = 2, 16, 32         # batch, seq, model_dim (S=16 -> two S tiles)
    N = 20                      # num_splats
    layer_idx = 0

    key = jax.random.PRNGKey(0)
    kx, kc, ks, ka, kv, ko = jax.random.split(key, 6)

    # deterministic "parameters" matching the module's __init__ distributions
    x = jax.random.normal(kx, (B, S, D), dtype=jnp.float32)
    centers = jax.random.normal(kc, (N, D), dtype=jnp.float32) * 0.2
    log_scales = jnp.log(1.0 + jax.random.uniform(ks, (N,), dtype=jnp.float32) * 0.5)
    amplitudes = 1.2 + jax.random.uniform(ka, (N,), dtype=jnp.float32) * 0.3
    std = 0.02 / math.sqrt(layer_idx + 1)
    wv = jax.random.normal(kv, (D, D), dtype=jnp.float32) * std   # token_value_proj.weight
    wo = jax.random.normal(ko, (D, D), dtype=jnp.float32) * std   # output_proj.weight

    ref = splatflow_attention_ref(x, centers, log_scales, amplitudes, wv, wo)

    # f32 MXU operands: tight parity with the PyTorch forward.
    out = splatflow_attention(x, centers, log_scales, amplitudes, wv, wo,
                              matmul_dtype=jnp.float32)
    out = jax.block_until_ready(out)
    assert out.shape == (B, S, D)
    # approx-reciprocal + matmul reassociation => slightly looser tolerance
    assert jnp.allclose(out, ref, atol=2e-4, rtol=2e-4), "f32 path mismatch vs reference"

    # bf16 MXU operands with f32 accumulation (production path on v6e/v7x).
    out_bf16 = splatflow_attention(x, centers, log_scales, amplitudes, wv, wo,
                                   matmul_dtype=jnp.bfloat16)
    out_bf16 = jax.block_until_ready(out_bf16)
    assert jnp.allclose(out_bf16, ref, atol=1e-2, rtol=1e-1), "bf16 path mismatch vs reference"

    print("KERNEL_OK")
</pallas_src>

<mosaic_0001>
module attributes {stable_mosaic.version = 11 : i64} {
  func.func @_splatflow_kernel(%arg0: i32, %arg1: i32, %arg2: i32, %arg3: memref<1x16x32xf32, #tpu.memory_space<vmem>>, %arg4: memref<32x20xf32, #tpu.memory_space<vmem>>, %arg5: memref<3x20xf32, #tpu.memory_space<vmem>>, %arg6: memref<32x32xf32, #tpu.memory_space<vmem>>, %arg7: memref<1x16x32xf32, #tpu.memory_space<vmem>>, %arg8: memref<20x32xf32, #tpu.memory_space<vmem>>) attributes {dimension_semantics = [#tpu.dimension_semantics<parallel>, #tpu.dimension_semantics<arbitrary>, #tpu.dimension_semantics<arbitrary>], iteration_bounds = array<i64: 2, 2, 1>, scalar_prefetch = 0 : i64, scratch_operands = 1 : i64, tpu.core_type = #tpu.core_type<tc>, window_params = [{transform_indices = @transform_0, window_bounds = array<i64: 1, 16, 32>}, {pipeline_mode = #tpu.pipeline_mode<synchronous>, transform_indices = @transform_1, window_bounds = array<i64: 32, 20>}, {pipeline_mode = #tpu.pipeline_mode<synchronous>, transform_indices = @transform_2, window_bounds = array<i64: 3, 20>}, {pipeline_mode = #tpu.pipeline_mode<synchronous>, transform_indices = @transform_3, window_bounds = array<i64: 32, 32>}, {transform_indices = @transform_4, window_bounds = array<i64: 1, 16, 32>}]} {
    %c0 = arith.constant 0 : index
    %c0_0 = arith.constant 0 : index
    %c0_1 = arith.constant 0 : index
    %0 = vector.load %arg3[%c0, %c0_0, %c0_1] : memref<1x16x32xf32, #tpu.memory_space<vmem>>, vector<1x16x32xf32>
    %1 = vector.shape_cast %0 : vector<1x16x32xf32> to vector<16x32xf32>
    %c0_2 = arith.constant 0 : index
    %c0_3 = arith.constant 0 : index
    %2 = vector.load %arg5[%c0_2, %c0_3] : memref<3x20xf32, #tpu.memory_space<vmem>>, vector<1x20xf32>
    %c1 = arith.constant 1 : index
    %c0_4 = arith.constant 0 : index
    %3 = vector.load %arg5[%c1, %c0_4] : memref<3x20xf32, #tpu.memory_space<vmem>>, vector<1x20xf32>
    %c2 = arith.constant 2 : index
    %c0_5 = arith.constant 0 : index
    %4 = vector.load %arg5[%c2, %c0_5] : memref<3x20xf32, #tpu.memory_space<vmem>>, vector<1x20xf32>
    %c0_6 = arith.constant 0 : index
    %c0_7 = arith.constant 0 : index
    %5 = vector.load %arg4[%c0_6, %c0_7] : memref<32x20xf32, #tpu.memory_space<vmem>>, vector<32x20xf32>
    %cst = arith.constant dense<0.000000e+00> : vector<16x20xf32>
    %6 = tpu.matmul %1, %5, %cst {dimension_numbers = #tpu.dot_dimension_numbers<[1], [0], [0], [1], [0, 0, 1, 1], [], []>} : vector<16x32xf32>, vector<32x20xf32>, vector<16x20xf32> -> vector<16x20xf32>
    %7 = arith.mulf %1, %1 : vector<16x32xf32>
    %cst_8 = arith.constant dense<0.000000e+00> : vector<16xf32>
    %8 = vector.multi_reduction <add>, %7, %cst_8 [1] : vector<16x32xf32> to vector<16xf32>
    %9 = vector.shape_cast %8 : vector<16xf32> to vector<16x1xf32>
    %10 = vector.broadcast %9 : vector<16x1xf32> to vector<16x20xf32>
    %11 = vector.broadcast %2 : vector<1x20xf32> to vector<16x20xf32>
    %12 = arith.mulf %10, %11 : vector<16x20xf32>
    %13 = vector.broadcast %3 : vector<1x20xf32> to vector<16x20xf32>
    %14 = arith.addf %12, %13 : vector<16x20xf32>
    %15 = arith.addf %14, %6 : vector<16x20xf32>
    %cst_9 = arith.constant 0.000000e+00 : f32
    %16 = vector.broadcast %cst_9 : f32 to vector<16x20xf32>
    %17 = arith.minimumf %15, %16 : vector<16x20xf32>
    %cst_10 = arith.constant -1.250000e+01 : f32
    %18 = vector.broadcast %cst_10 : f32 to vector<16x20xf32>
    %19 = arith.maximumf %17, %18 : vector<16x20xf32>
    %20 = math.exp %19 : vector<16x20xf32>
    %21 = vector.broadcast %4 : vector<1x20xf32> to vector<16x20xf32>
    %22 = arith.mulf %20, %21 : vector<16x20xf32>
    %cst_11 = arith.constant dense<0.000000e+00> : vector<16xf32>
    %23 = vector.multi_reduction <add>, %22, %cst_11 [1] : vector<16x20xf32> to vector<16xf32>
    %24 = vector.shape_cast %23 : vector<16xf32> to vector<16x1xf32>
    %cst_12 = arith.constant 9.99999993E-9 : f32
    %25 = vector.broadcast %cst_12 : f32 to vector<16x1xf32>
    %26 = arith.maximumf %24, %25 : vector<16x1xf32>
    %27 = tpu.reciprocal %26 {approx = true} : vector<16x1xf32> -> vector<16x1xf32>
    %28 = vector.broadcast %27 : vector<16x1xf32> to vector<16x20xf32>
    %29 = arith.mulf %22, %28 : vector<16x20xf32>
    %c0_i32 = arith.constant 0 : i32
    %30 = arith.cmpi eq, %arg1, %c0_i32 : i32
    %31 = arith.extui %30 : i1 to i32
    %c0_i32_13 = arith.constant 0 : i32
    %32 = arith.cmpi ne, %31, %c0_i32_13 : i32
    scf.if %32 {
      %c0_i32_15 = arith.constant 0 : i32
      %36 = arith.cmpi eq, %arg2, %c0_i32_15 : i32
      %37 = arith.extui %36 : i1 to i32
      %c0_i32_16 = arith.constant 0 : i32
      %38 = arith.cmpi ne, %37, %c0_i32_16 : i32
      scf.if %38 {
        %cst_24 = arith.constant 0.000000e+00 : f32
        %46 = vector.broadcast %cst_24 : f32 to vector<20x32xf32>
        %c0_25 = arith.constant 0 : index
        %c0_26 = arith.constant 0 : index
        %47 = vector.load %arg8[%c0_25, %c0_26] : memref<20x32xf32, #tpu.memory_space<vmem>>, vector<20x32xf32>
        tpu.vector_store %arg8[%c0_25, %c0_26], %46 {strides = array<i32>} : memref<20x32xf32, #tpu.memory_space<vmem>>, vector<20x32xf32>,
      } else {
      }
      %c0_17 = arith.constant 0 : index
      %c0_18 = arith.constant 0 : index
      %39 = vector.load %arg8[%c0_17, %c0_18] : memref<20x32xf32, #tpu.memory_space<vmem>>, vector<20x32xf32>
      %cst_19 = arith.constant dense<0.000000e+00> : vector<20x32xf32>
      %40 = tpu.matmul %29, %1, %cst_19 {dimension_numbers = #tpu.dot_dimension_numbers<[0], [0], [1], [1], [0, 1, 1, 1], [], []>} : vector<16x20xf32>, vector<16x32xf32>, vector<20x32xf32> -> vector<20x32xf32>
      %41 = arith.addf %39, %40 : vector<20x32xf32>
      %c0_20 = arith.constant 0 : index
      %c0_21 = arith.constant 0 : index
      %42 = vector.load %arg8[%c0_20, %c0_21] : memref<20x32xf32, #tpu.memory_space<vmem>>, vector<20x32xf32>
      tpu.vector_store %arg8[%c0_20, %c0_21], %41 {strides = array<i32>} : memref<20x32xf32, #tpu.memory_space<vmem>>, vector<20x32xf32>,
      %c0_i32_22 = arith.constant 0 : i32
      %43 = arith.cmpi eq, %arg2, %c0_i32_22 : i32
      %44 = arith.extui %43 : i1 to i32
      %c0_i32_23 = arith.constant 0 : i32
      %45 = arith.cmpi ne, %44, %c0_i32_23 : i32
      scf.if %45 {
        %c0_24 = arith.constant 0 : index
        %c0_25 = arith.constant 0 : index
        %46 = vector.load %arg8[%c0_24, %c0_25] : memref<20x32xf32, #tpu.memory_space<vmem>>, vector<20x32xf32>
        %c0_26 = arith.constant 0 : index
        %c0_27 = arith.constant 0 : index
        %47 = vector.load %arg6[%c0_26, %c0_27] : memref<32x32xf32, #tpu.memory_space<vmem>>, vector<32x32xf32>
        %cst_28 = arith.constant dense<0.000000e+00> : vector<20x32xf32>
        %48 = tpu.matmul %46, %47, %cst_28 {dimension_numbers = #tpu.dot_dimension_numbers<[1], [0], [0], [1], [0, 0, 1, 1], [], []>} : vector<20x32xf32>, vector<32x32xf32>, vector<20x32xf32> -> vector<20x32xf32>
        %c0_29 = arith.constant 0 : index
        %c0_30 = arith.constant 0 : index
        %49 = vector.load %arg8[%c0_29, %c0_30] : memref<20x32xf32, #tpu.memory_space<vmem>>, vector<20x32xf32>
        tpu.vector_store %arg8[%c0_29, %c0_30], %48 {strides = array<i32>} : memref<20x32xf32, #tpu.memory_space<vmem>>, vector<20x32xf32>,
      } else {
      }
    } else {
    }
    %c1_i32 = arith.constant 1 : i32
    %33 = arith.cmpi eq, %arg1, %c1_i32 : i32
    %34 = arith.extui %33 : i1 to i32
    %c0_i32_14 = arith.constant 0 : i32
    %35 = arith.cmpi ne, %34, %c0_i32_14 : i32
    scf.if %35 {
      %c0_15 = arith.constant 0 : index
      %c0_16 = arith.constant 0 : index
      %36 = vector.load %arg8[%c0_15, %c0_16] : memref<20x32xf32, #tpu.memory_space<vmem>>, vector<20x32xf32>
      %cst_17 = arith.constant dense<0.000000e+00> : vector<16x32xf32>
      %37 = tpu.matmul %29, %36, %cst_17 {dimension_numbers = #tpu.dot_dimension_numbers<[1], [0], [0], [1], [0, 0, 1, 1], [], []>} : vector<16x20xf32>, vector<20x32xf32>, vector<16x32xf32> -> vector<16x32xf32>
      %c0_18 = arith.constant 0 : index
      %c0_19 = arith.constant 0 : index
      %c0_20 = arith.constant 0 : index
      %38 = vector.load %arg7[%c0_18, %c0_19, %c0_20] : memref<1x16x32xf32, #tpu.memory_space<vmem>>, vector<1x16x32xf32>
      %39 = vector.shape_cast %38 : vector<1x16x32xf32> to vector<16x32xf32>
      %40 = vector.shape_cast %37 : vector<16x32xf32> to vector<1x16x32xf32>
      tpu.vector_store %arg7[%c0_18, %c0_19, %c0_20], %40 {strides = array<i32>} : memref<1x16x32xf32, #tpu.memory_space<vmem>>, vector<1x16x32xf32>,
    } else {
    }
    return
  }
  func.func @transform_0(%arg0: i32, %arg1: i32, %arg2: i32) -> (i32, i32, i32) {
    %c0_i32 = arith.constant 0 : i32
    %c0_i32_0 = arith.constant 0 : i32
    return %arg0, %arg2, %c0_i32 : i32, i32, i32
  }
  func.func @transform_1(%arg0: i32, %arg1: i32, %arg2: i32) -> (i32, i32) {
    %c0_i32 = arith.constant 0 : i32
    %c0_i32_0 = arith.constant 0 : i32
    %c0_i32_1 = arith.constant 0 : i32
    return %c0_i32, %c0_i32_0 : i32, i32
  }
  func.func @transform_2(%arg0: i32, %arg1: i32, %arg2: i32) -> (i32, i32) {
    %c0_i32 = arith.constant 0 : i32
    %c0_i32_0 = arith.constant 0 : i32
    %c0_i32_1 = arith.constant 0 : i32
    return %c0_i32, %c0_i32_0 : i32, i32
  }
  func.func @transform_3(%arg0: i32, %arg1: i32, %arg2: i32) -> (i32, i32) {
    %c0_i32 = arith.constant 0 : i32
    %c0_i32_0 = arith.constant 0 : i32
    %c0_i32_1 = arith.constant 0 : i32
    return %c0_i32, %c0_i32_0 : i32, i32
  }
  func.func @transform_4(%arg0: i32, %arg1: i32, %arg2: i32) -> (i32, i32, i32) {
    %0 = arith.muli %arg1, %arg2 : i32
    %c0_i32 = arith.constant 0 : i32
    %c0_i32_0 = arith.constant 0 : i32
    return %arg0, %0, %c0_i32 : i32, i32, i32
  }
}

module attributes {stable_mosaic.version = 11 : i64} {
  func.func @_splatflow_kernel(%arg0: i32, %arg1: i32, %arg2: i32, %arg3: memref<1x16x32xf32, #tpu.memory_space<vmem>>, %arg4: memref<32x20xf32, #tpu.memory_space<vmem>>, %arg5: memref<3x20xf32, #tpu.memory_space<vmem>>, %arg6: memref<32x32xf32, #tpu.memory_space<vmem>>, %arg7: memref<1x16x32xf32, #tpu.memory_space<vmem>>, %arg8: memref<20x32xf32, #tpu.memory_space<vmem>>) attributes {dimension_semantics = [#tpu.dimension_semantics<parallel>, #tpu.dimension_semantics<arbitrary>, #tpu.dimension_semantics<arbitrary>], iteration_bounds = array<i64: 2, 2, 1>, scalar_prefetch = 0 : i64, scratch_operands = 1 : i64, tpu.core_type = #tpu.core_type<tc>, window_params = [{transform_indices = @transform_0, window_bounds = array<i64: 1, 16, 32>}, {pipeline_mode = #tpu.pipeline_mode<synchronous>, transform_indices = @transform_1, window_bounds = array<i64: 32, 20>}, {pipeline_mode = #tpu.pipeline_mode<synchronous>, transform_indices = @transform_2, window_bounds = array<i64: 3, 20>}, {pipeline_mode = #tpu.pipeline_mode<synchronous>, transform_indices = @transform_3, window_bounds = array<i64: 32, 32>}, {transform_indices = @transform_4, window_bounds = array<i64: 1, 16, 32>}]} {
    %c0 = arith.constant 0 : index
    %c0_0 = arith.constant 0 : index
    %c0_1 = arith.constant 0 : index
    %0 = vector.load %arg3[%c0, %c0_0, %c0_1] : memref<1x16x32xf32, #tpu.memory_space<vmem>>, vector<1x16x32xf32>
    %1 = vector.shape_cast %0 : vector<1x16x32xf32> to vector<16x32xf32>
    %c0_2 = arith.constant 0 : index
    %c0_3 = arith.constant 0 : index
    %2 = vector.load %arg5[%c0_2, %c0_3] : memref<3x20xf32, #tpu.memory_space<vmem>>, vector<1x20xf32>
    %c1 = arith.constant 1 : index
    %c0_4 = arith.constant 0 : index
    %3 = vector.load %arg5[%c1, %c0_4] : memref<3x20xf32, #tpu.memory_space<vmem>>, vector<1x20xf32>
    %c2 = arith.constant 2 : index
    %c0_5 = arith.constant 0 : index
    %4 = vector.load %arg5[%c2, %c0_5] : memref<3x20xf32, #tpu.memory_space<vmem>>, vector<1x20xf32>
    %c0_6 = arith.constant 0 : index
    %c0_7 = arith.constant 0 : index
    %5 = vector.load %arg4[%c0_6, %c0_7] : memref<32x20xf32, #tpu.memory_space<vmem>>, vector<32x20xf32>
    %cst = arith.constant dense<0.000000e+00> : vector<16x20xf32>
    %6 = tpu.matmul %1, %5, %cst {dimension_numbers = #tpu.dot_dimension_numbers<[1], [0], [0], [1], [0, 0, 1, 1], [], []>} : vector<16x32xf32>, vector<32x20xf32>, vector<16x20xf32> -> vector<16x20xf32>
    %7 = arith.mulf %1, %1 : vector<16x32xf32>
    %cst_8 = arith.constant dense<0.000000e+00> : vector<16xf32>
    %8 = vector.multi_reduction <add>, %7, %cst_8 [1] : vector<16x32xf32> to vector<16xf32>
    %9 = vector.shape_cast %8 : vector<16xf32> to vector<16x1xf32>
    %10 = vector.broadcast %9 : vector<16x1xf32> to vector<16x20xf32>
    %11 = vector.broadcast %2 : vector<1x20xf32> to vector<16x20xf32>
    %12 = arith.mulf %10, %11 : vector<16x20xf32>
    %13 = vector.broadcast %3 : vector<1x20xf32> to vector<16x20xf32>
    %14 = arith.addf %12, %13 : vector<16x20xf32>
    %15 = arith.addf %14, %6 : vector<16x20xf32>
    %cst_9 = arith.constant 0.000000e+00 : f32
    %16 = vector.broadcast %cst_9 : f32 to vector<16x20xf32>
    %17 = arith.minimumf %15, %16 : vector<16x20xf32>
    %cst_10 = arith.constant -1.250000e+01 : f32
    %18 = vector.broadcast %cst_10 : f32 to vector<16x20xf32>
    %19 = arith.maximumf %17, %18 : vector<16x20xf32>
    %20 = math.exp %19 : vector<16x20xf32>
    %21 = vector.broadcast %4 : vector<1x20xf32> to vector<16x20xf32>
    %22 = arith.mulf %20, %21 : vector<16x20xf32>
    %cst_11 = arith.constant dense<0.000000e+00> : vector<16xf32>
    %23 = vector.multi_reduction <add>, %22, %cst_11 [1] : vector<16x20xf32> to vector<16xf32>
    %24 = vector.shape_cast %23 : vector<16xf32> to vector<16x1xf32>
    %cst_12 = arith.constant 9.99999993E-9 : f32
    %25 = vector.broadcast %cst_12 : f32 to vector<16x1xf32>
    %26 = arith.maximumf %24, %25 : vector<16x1xf32>
    %27 = tpu.reciprocal %26 {approx = true} : vector<16x1xf32> -> vector<16x1xf32>
    %28 = vector.broadcast %27 : vector<16x1xf32> to vector<16x20xf32>
    %29 = arith.mulf %22, %28 : vector<16x20xf32>
    %c0_i32 = arith.constant 0 : i32
    %30 = arith.cmpi eq, %arg1, %c0_i32 : i32
    %31 = arith.extui %30 : i1 to i32
    %c0_i32_13 = arith.constant 0 : i32
    %32 = arith.cmpi ne, %31, %c0_i32_13 : i32
    scf.if %32 {
      %c0_i32_15 = arith.constant 0 : i32
      %36 = arith.cmpi eq, %arg2, %c0_i32_15 : i32
      %37 = arith.extui %36 : i1 to i32
      %c0_i32_16 = arith.constant 0 : i32
      %38 = arith.cmpi ne, %37, %c0_i32_16 : i32
      scf.if %38 {
        %cst_24 = arith.constant 0.000000e+00 : f32
        %46 = vector.broadcast %cst_24 : f32 to vector<20x32xf32>
        %c0_25 = arith.constant 0 : index
        %c0_26 = arith.constant 0 : index
        %47 = vector.load %arg8[%c0_25, %c0_26] : memref<20x32xf32, #tpu.memory_space<vmem>>, vector<20x32xf32>
        tpu.vector_store %arg8[%c0_25, %c0_26], %46 {strides = array<i32>} : memref<20x32xf32, #tpu.memory_space<vmem>>, vector<20x32xf32>,
      } else {
      }
      %c0_17 = arith.constant 0 : index
      %c0_18 = arith.constant 0 : index
      %39 = vector.load %arg8[%c0_17, %c0_18] : memref<20x32xf32, #tpu.memory_space<vmem>>, vector<20x32xf32>
      %cst_19 = arith.constant dense<0.000000e+00> : vector<20x32xf32>
      %40 = tpu.matmul %29, %1, %cst_19 {dimension_numbers = #tpu.dot_dimension_numbers<[0], [0], [1], [1], [0, 1, 1, 1], [], []>} : vector<16x20xf32>, vector<16x32xf32>, vector<20x32xf32> -> vector<20x32xf32>
      %41 = arith.addf %39, %40 : vector<20x32xf32>
      %c0_20 = arith.constant 0 : index
      %c0_21 = arith.constant 0 : index
      %42 = vector.load %arg8[%c0_20, %c0_21] : memref<20x32xf32, #tpu.memory_space<vmem>>, vector<20x32xf32>
      tpu.vector_store %arg8[%c0_20, %c0_21], %41 {strides = array<i32>} : memref<20x32xf32, #tpu.memory_space<vmem>>, vector<20x32xf32>,
      %c0_i32_22 = arith.constant 0 : i32
      %43 = arith.cmpi eq, %arg2, %c0_i32_22 : i32
      %44 = arith.extui %43 : i1 to i32
      %c0_i32_23 = arith.constant 0 : i32
      %45 = arith.cmpi ne, %44, %c0_i32_23 : i32
      scf.if %45 {
        %c0_24 = arith.constant 0 : index
        %c0_25 = arith.constant 0 : index
        %46 = vector.load %arg8[%c0_24, %c0_25] : memref<20x32xf32, #tpu.memory_space<vmem>>, vector<20x32xf32>
        %c0_26 = arith.constant 0 : index
        %c0_27 = arith.constant 0 : index
        %47 = vector.load %arg6[%c0_26, %c0_27] : memref<32x32xf32, #tpu.memory_space<vmem>>, vector<32x32xf32>
        %cst_28 = arith.constant dense<0.000000e+00> : vector<20x32xf32>
        %48 = tpu.matmul %46, %47, %cst_28 {dimension_numbers = #tpu.dot_dimension_numbers<[1], [0], [0], [1], [0, 0, 1, 1], [], []>} : vector<20x32xf32>, vector<32x32xf32>, vector<20x32xf32> -> vector<20x32xf32>
        %c0_29 = arith.constant 0 : index
        %c0_30 = arith.constant 0 : index
        %49 = vector.load %arg8[%c0_29, %c0_30] : memref<20x32xf32, #tpu.memory_space<vmem>>, vector<20x32xf32>
        tpu.vector_store %arg8[%c0_29, %c0_30], %48 {strides = array<i32>} : memref<20x32xf32, #tpu.memory_space<vmem>>, vector<20x32xf32>,
      } else {
      }
    } else {
    }
    %c1_i32 = arith.constant 1 : i32
    %33 = arith.cmpi eq, %arg1, %c1_i32 : i32
    %34 = arith.extui %33 : i1 to i32
    %c0_i32_14 = arith.constant 0 : i32
    %35 = arith.cmpi ne, %34, %c0_i32_14 : i32
    scf.if %35 {
      %c0_15 = arith.constant 0 : index
      %c0_16 = arith.constant 0 : index
      %36 = vector.load %arg8[%c0_15, %c0_16] : memref<20x32xf32, #tpu.memory_space<vmem>>, vector<20x32xf32>
      %cst_17 = arith.constant dense<0.000000e+00> : vector<16x32xf32>
      %37 = tpu.matmul %29, %36, %cst_17 {dimension_numbers = #tpu.dot_dimension_numbers<[1], [0], [0], [1], [0, 0, 1, 1], [], []>} : vector<16x20xf32>, vector<20x32xf32>, vector<16x32xf32> -> vector<16x32xf32>
      %c0_18 = arith.constant 0 : index
      %c0_19 = arith.constant 0 : index
      %c0_20 = arith.constant 0 : index
      %38 = vector.load %arg7[%c0_18, %c0_19, %c0_20] : memref<1x16x32xf32, #tpu.memory_space<vmem>>, vector<1x16x32xf32>
      %39 = vector.shape_cast %38 : vector<1x16x32xf32> to vector<16x32xf32>
      %40 = vector.shape_cast %37 : vector<16x32xf32> to vector<1x16x32xf32>
      tpu.vector_store %arg7[%c0_18, %c0_19, %c0_20], %40 {strides = array<i32>} : memref<1x16x32xf32, #tpu.memory_space<vmem>>, vector<1x16x32xf32>,
    } else {
    }
    return
  }
  func.func @transform_0(%arg0: i32, %arg1: i32, %arg2: i32) -> (i32, i32, i32) {
    %c0_i32 = arith.constant 0 : i32
    %c0_i32_0 = arith.constant 0 : i32
    return %arg0, %arg2, %c0_i32 : i32, i32, i32
  }
  func.func @transform_1(%arg0: i32, %arg1: i32, %arg2: i32) -> (i32, i32) {
    %c0_i32 = arith.constant 0 : i32
    %c0_i32_0 = arith.constant 0 : i32
    %c0_i32_1 = arith.constant 0 : i32
    return %c0_i32, %c0_i32_0 : i32, i32
  }
  func.func @transform_2(%arg0: i32, %arg1: i32, %arg2: i32) -> (i32, i32) {
    %c0_i32 = arith.constant 0 : i32
    %c0_i32_0 = arith.constant 0 : i32
    %c0_i32_1 = arith.constant 0 : i32
    return %c0_i32, %c0_i32_0 : i32, i32
  }
  func.func @transform_3(%arg0: i32, %arg1: i32, %arg2: i32) -> (i32, i32) {
    %c0_i32 = arith.constant 0 : i32
    %c0_i32_0 = arith.constant 0 : i32
    %c0_i32_1 = arith.constant 0 : i32
    return %c0_i32, %c0_i32_0 : i32, i32
  }
  func.func @transform_4(%arg0: i32, %arg1: i32, %arg2: i32) -> (i32, i32, i32) {
    %0 = arith.muli %arg1, %arg2 : i32
    %c0_i32 = arith.constant 0 : i32
    %c0_i32_0 = arith.constant 0 : i32
    return %arg0, %0, %c0_i32 : i32, i32, i32
  }
}

</mosaic_0001>

<bundles_post_ra>
// kernel: tpu_custom_call.1
= control target key start
LH: loop header
LB: loop body
LE: loop exit
PB: predicated region body
PF: predicated region fallthrough
CT: control target
= control target key end

     0   :  { %9 = vsyncpa [#allocation4], 0  ;;  %s1451_s0 = inlined_call_operand.vmem [shape: f32[2,16,32], index: 0, kind: input, shape index: {}]   ;;  %s1452_s1 = inlined_call_operand.vmem [shape: f32[32,20], index: 1, kind: input, shape index: {}]   ;;  %s1453_s2 = inlined_call_operand.vmem [shape: f32[3,20], index: 2, kind: input, shape index: {}]   ;;  %s1454_s3 = inlined_call_operand.hbm [shape: f32[32,32], index: 3, kind: input, shape index: {}]   ;;  %s1455_s4 = inlined_call_operand.hbm [shape: f32[2,16,32], index: 4, kind: output, shape index: {}]  }
   0x1   :  { %10 = vsyncpa [#allocation5], 0 }
   0x2   :  { %12 = vsyncpa [#allocation5 + $0x1], 0  ;;  %s1205_s15 = smov 0   ;;  %s1207_s16 = smov 0  }
   0x3   :  { %s1209_s17 = smov 0   ;;  %s1211_s18 = smov 0  }
   0x4   :  { %s1213_s19 = smov 0   ;;  %s1215_s20 = smov 0  }
   0x5   :  { %s1217_s21 = smov 0   ;;  %s1219_s22 = smov 0  }
   0x6 LB: > { %s846_s23 = sadd.s32 4294967295, %s1170_s22   ;;  %s847_s24 = sadd.s32 4294967294, %s1170_s22   ;;  %s1170_s22 = sphi %s1219_s22, %s18_s22   ;;  %s1166_s21 = sphi %s1217_s21, %s1467_s21   ;;  %s1162_s20 = sphi %s1215_s20, %s1466_s20   ;;  %s1158_s19 = sphi %s1213_s19, %s1465_s19   ;;  %s1154_s18 = sphi %s1211_s18, %s1464_s18   ;;  %s1150_s17 = sphi %s1209_s17, %s1463_s17   ;;  %s1146_s16 = sphi %s1207_s16, %s1462_s16   ;;  %s1142_s15 = sphi %s1205_s15, %s1461_s15  }
   0x7   : > { %s33_s25 = sadd.s32 1, %s1162_s20  ;;  %s37_s26 = sadd.s32 1, %s1166_s21 }
   0x8   : > { %p35_p0 = scmp.ge.s32.totalorder %s33_s25, 2  ;;  %s139_s27 = sadd.s32 1, %s1150_s17 }
   0x9   : > { %p149_p1 = scmp.ne.s32.totalorder %s1150_s17, %s1146_s16  ;;  %p150_p2 = scmp.eq.s32.totalorder %s846_s23, 3 }
   0xa   : > { %s1469_s25 = smov (%p35_p0, %s33_s25), 0  ;;  %s1471_s26 = smov (!%p35_p0, %s37_s26), %s1166_s21 }
   0xb   : > { %p1255_p3 = por %p150_p2, %p149_p1  ;;  %p155_p4 = scmp.ne.s32.totalorder %s1146_s16, %s1142_s15 }
   0xc   : > { %p39_p5 = scmp.ge.s32.totalorder %s1471_s26, 2  ;;  %p156_p6 = scmp.eq.s32.totalorder %s847_s24, 3 }
   0xd   : > { %p848_p7 = scmp.ge.s32.totalorder %s1170_s22, 1  ;;  %p163_p8 = scmp.lt.s32.totalorder %s1170_s22, 5 }
   0xe   : > { %s1473_s26 = smov (%p39_p5, %s1471_s26), 0  ;;  %p1265_p9 = por %p156_p6, %p155_p4 }
   0xf   : > { %p1269_p10 = pnand %p848_p7, %p163_p8  ;;  %s134_s5 = ssub.s32 %s1166_s21, %s1473_s26 }
  0x10   : > { %p137_p11 = scmp.eq.s32.totalorder %s134_s5, 0  ;;  %p1277_p13 = scmp.eq.s32.totalorder %s846_s23, 0 }
  0x11   : > { %p958_p12 = pneg %p1269_p10  ;;  %s1172_s8 = smov [#allocation3]  }
  0x12   : > { %s1282_s7 = scalar_select %p137_p11, %s1150_s17, %s139_s27  }
  0x13   : > { %s181_s9 = sshll.u32 %s1172_s8, 4  ;;  %p1286_p0 = pnand %p1277_p13, %p958_p12  ;;  %s182_s9 = int_to_ptr.vmem [resolvable:$true] %s181_s9 }
  0x14   : > { %s1059_s11 = scalar_lea.vmem %s182_s9, 512  ;;  %p1067_p6 = scmp.lt.s32.totalorder %s182_s9, %s182_s9 }
  0x15   : > { %p1050_p1 = pneg %p1286_p0  ;;  %p1060_p2 = scmp.ne.s32.totalorder %s182_s9, %s1059_s11 }
  0x16   : > { %p1068_p7 = scmp.lt.s32.totalorder %s1059_s11, %s1059_s11 }
  0x17   : > { %p1062_p4 = pnand %p1060_p2, %p1050_p1 }
  0x18   : > { %p1069_p8 = por %p1068_p7, %p1067_p6 }
  0x19   : > { %p1063_p5 = pneg %p1062_p4 }
  0x1b   : > { %p1070_p11 = pnand %p1069_p8, %p1063_p5 }
  0x1d   : > { %1073 = shalt.err (!%p1070_p11)
}
  0x1e   : > { %s1173_s12 = smov 128   ;;  %s1174_s13 = smov 8  }
  0x1f   : > { %961 = dma.hbm_to_vmem [thread:$0]  (!%p1286_p0), %s1454_s3, 512, %s182_s9, [#allocation4], %s1173_s12, %s1173_s12, %s1174_s13  }
  0x20   : > { %210 = sbr.rel (%p1269_p10) target bundleno = 1191 (0x4a7), region = 36 }
  0x25   : > { %1133 = dma.done.wait (%p1277_p13), [#allocation4], 512  }
  0x26   : > { %1135 = vsyncadd (%p1277_p13), [#allocation4], 4294966784  ;;  %s237_s24 = sand.u32 1, %s1146_s16   ;;  %p241_p12 = scmp.lt.s32.totalorder %s1158_s19, 1  ;;  %vm261_vm0 = vcmask 261120   ;;  %v260_v0 = vld [vmem:[%s1452_s1 + $0x18] sm:$0xff] }
  0x27   : > { %s1307_s27 = sshll.u32 %s237_s24, 4  ;;  %v259_v1 = vld [vmem:[%s1452_s1 + $0x10] sm:$0xff]  ;;  %902 = vmatprep.subr.mxu0 %v260_v0  ;;  %v258_v4 = vld [vmem:[%s1452_s1 + $0x8] sm:$0xff]  ;;  %v257_v7 = vld [vmem:[%s1452_s1] sm:$0xff]  ;;  %vm379_vm1 = vcmask 162816   ;;  %p861_p10 = scmp.ne.s32.totalorder %s1154_s18, 0 }
  0x28   : > { %s242_s5 = scalar_select %p241_p12, %s1158_s19, 1  ;;  %903 = vmatpush3.msra.mxu0 %v260_v0  ;;  %v858_v11 = vld [vmem:[%s1453_s2] ss:$0 sm:$0xff]  ;;  %v859_v14 = vld [vmem:[%s1453_s2 + $0x1] ss:$0 sm:$0xff] }
  0x29   : > { %904 = vmatprep.subr.mxu0 %v259_v1  ;;  %v860_v30 = vld [vmem:[%s1453_s2 + $0x2] ss:$0 sm:$0xff]  ;;  %s1355_s13 = scalar_lea.vmem [#allocation6], %s1307_s27 }
  0x2a   : > { %s877_s8 = sshll.u32 %s242_s5, 4  ;;  %905 = vmatpush3.msra.mxu0 %v259_v1 }
  0x2b   : > { %s248_s10 = scalar_lea.vmem %s1451_s0, %s877_s8  ;;  %906 = vmatprep.subr.mxu0 %v258_v4 }
  0x2c   : > { %v1319_v2 = vld [vmem:[%s248_s10] sm:$0xff]  ;;  %v1321_v3 = vld [vmem:[%s248_s10 + $0x8] sm:$0xff]  ;;  %907 = vmatpush3.msra.mxu0 %v258_v4 }
  0x2d   : > { %910 = vmatprep.mubr.msk.f32.mxu0 %vm261_vm0, %v1319_v2  ;;  %v343_v5 = vmul.f32 %v1319_v2, %v1319_v2  ;;  %v344_v6 = vmul.f32 %v1321_v3, %v1321_v3  ;;  %908 = vmatprep.subr.mxu0 %v257_v7 }
  0x2e   : > { %909 = vmatpush3.msra.mxu0 %v257_v7 }
  0x2f   : > { %v345_v8 = vsel %vm261_vm0, %v343_v5, 0.0  ;;  %v348_v9 = vsel %vm261_vm0, %v344_v6, 0.0  ;;  %911 = vmatmul.mubr.msk.f32.vlgmr.msra.gmra.mxu0 %vm261_vm0, %v1321_v3 }
  0x30   : > { %346 = vadd.xlane.f32.xlu0 %v345_v8 }
  0x34   : > { %349 = vadd.xlane.f32.xlu0 %v348_v9 }
  0xb9   : > { %v347_v10 = vpop.xlane.xlu0 %346 }
  0xba   : > { %v355_v15 = vmul.f32 %v858_v11, %v347_v10 }
  0xbc   : > { %v361_v17 = vadd.f32 %v859_v14, %v355_v15 }
  0xbd   : > { %v350_v12 = vpop.xlane.xlu0 %349 }
  0xbe   : > { %v356_v13 = vmul.f32 %v858_v11, %v350_v12 }
  0xc0   : > { %v362_v16 = vadd.f32 %v859_v14, %v356_v13 }
  0xef   : > { %v912_v18 = vpop.f32.mrf.mxu0 }
  0xf0   : > { %v364_v19 = vadd.f32 %v912_v18, %v362_v16 }
  0xf1   : > { %v334_v20 = vpop.f32.mrf.mxu0 }
  0xf2   : > { %v366_v21 = vmin.f32 %v364_v19, 0.0  ;;  %v363_v22 = vadd.f32 %v361_v17, %v334_v20 }
  0xf4   : > { %v368_v23 = vmax.f32 %v366_v21, -12.5  ;;  %v365_v24 = vmin.f32 %v363_v22, 0.0 }
  0xf6   : > { %v371_v25 = vmul.f32 1.442695, %v368_v23  ;;  %v367_v26 = vmax.f32 %v365_v24, -12.5 }
  0xf8   : > { %v369_v27 = vmul.f32 1.442695, %v367_v26  ;;  %1040 = vpow2.f32 %v371_v25 }
  0xfa   : > { %1042 = vpow2.f32 %v369_v27 }
 0x105   : > { %v1041_v28 = vpop.eup %1040 }
 0x106   : > { %v378_v33 = vmul.f32 %v1041_v28, %v860_v30 }
 0x107   : > { %v1043_v29 = vpop.eup %1042 }
 0x108   : > { %v377_v31 = vmul.f32 %v1043_v29, %v860_v30  ;;  %v383_v34 = vsel %vm379_vm1, %v378_v33, 0.0 }
 0x10a   : > { %v380_v32 = vsel %vm379_vm1, %v377_v31, 0.0 }
 0x10b   : > { %381 = vadd.xlane.f32.xlu1 %v380_v32 }
 0x10f   : > { %384 = vadd.xlane.f32.xlu1 %v383_v34 }
 0x194   : > { %v382_v35 = vpop.xlane.xlu1 %381 }
 0x195   : > { %v386_v36 = vmax.f32 %v382_v35, 1e-08 }
 0x197   : > { %1044 = vrcp.f32 %v386_v36 }
 0x198   : > { %v385_v37 = vpop.xlane.xlu1 %384 }
 0x199   : > { %v387_v38 = vmax.f32 %v385_v37, 1e-08 }
 0x19b   : > { %1046 = vrcp.f32 %v387_v38 }
 0x1a4   : > { %v1045_v39 = vpop.eup %1044 }
 0x1a5   : > { %v1350_v40 = vmul.f32 %v1045_v39, %v377_v31  ;;  %395 = sbr.rel (%p861_p10) target bundleno = 957 (0x3bd), region = 44 }
 0x1a8   : > { %v1047_v41 = vpop.eup %1046 }
 0x1a9   : > { %v1352_v42 = vmul.f32 %v1047_v41, %v378_v33 }
 0x1aa   : > { %407 = vxpose.xlu0.b32.start [1/2] (short) (narrow) %v1350_v40, 24  ;;  %v1175_v43 = vmov 0.0   ;;  %vm1176_vm2 = vmmov 0   ;;  %vm439_vm3 = vcmask 130048   ;;  %vm402_vm4 = vcmask 257024   ;;  %v545_v47 = vld [vmem:[#allocation3 + $0x18] sm:$0xff] }
 0x1ab   : > { %913 = vmatprep.subr.mxu0 %v1175_v43  ;;  %400 = vst.msk [vmem:[#allocation2] sm:$0xff] %vm261_vm0, %v1175_v43  ;;  %401 = vst.msk [vmem:[#allocation2 + $0x8] sm:$0xff] %vm261_vm0, %v1175_v43  ;;  %917 = vmatprep.mubr.msk.f32.mxu0 %vm1176_vm2, %v1175_v43  ;;  %v544_v48 = vld [vmem:[#allocation3 + $0x10] sm:$0xff]  ;;  %v543_v49 = vld [vmem:[#allocation3 + $0x8] sm:$0xff] }
 0x1ac   : > { %914 = vmatpush3.msra.mxu0 %v1321_v3  ;;  %926 = vmatprep.subr.mxu1 %v1175_v43  ;;  %403 = vst.msk [vmem:[#allocation2 + $0x10] sm:$0xf] %vm402_vm4, %v1175_v43  ;;  %v542_v50 = vld [vmem:[#allocation3] sm:$0xff] }
 0x1ad   : > { %915 = vmatprep.subr.mxu0 %v1175_v43  ;;  %934 = vmatprep.mubr.msk.f32.mxu1 %vm1176_vm2, %v1175_v43 }
 0x1ae   : > { %408 = vxpose.xlu0.b32.end [2/2] (short) (narrow) %v1352_v42, 24  ;;  %916 = vmatpush3.msra.mxu0 %v1319_v2 }
 0x1af   : > { %927 = vmatpush3.msra.mxu1 %v545_v47 }
 0x1b0   : > { %928 = vmatprep.subr.mxu1 %v1175_v43 }
 0x1b1   : > { %929 = vmatpush3.msra.mxu1 %v544_v48 }
 0x1b2   : > { %930 = vmatprep.subr.mxu1 %v1175_v43  ;;  %v404_v51 = vld [vmem:[#allocation2] sm:$0xff]  ;;  %v405_v55 = vld [vmem:[#allocation2 + $0x8] sm:$0xff] }
 0x1b3   : > { %931 = vmatpush3.msra.mxu1 %v543_v49  ;;  %v406_v59 = vld [vmem:[#allocation2 + $0x10] sm:$0xf] }
 0x1b4   : > { %932 = vmatprep.subr.mxu1 %v1175_v43 }
 0x1b5   : > { %933 = vmatpush3.msra.mxu1 %v542_v50 }
 0x226   : > { %v423_v44 = vpop.trf.xlu0 }
 0x227   : > { %918 = vmatmul.mubr.msk.f32.vlgmr.msra.gmra.mxu0 %vm439_vm3, %v423_v44 }
 0x228   : > { %920 = vmatprep.mubr.msk.f32.mxu0 %vm1176_vm2, %v1175_v43 }
 0x22a   : > { %v424_v45 = vpop.trf.xlu0 }
 0x22b   : > { %921 = vmatmul.mubr.msk.f32.gmra.mxu0 %vm439_vm3, %v424_v45 }
 0x22c   : > { %923 = vmatprep.mubr.msk.f32.mxu0 %vm1176_vm2, %v1175_v43 }
 0x22e   : > { %v425_v46 = vpop.trf.xlu0 }
 0x22f   : > { %924 = vmatmul.mubr.msk.f32.gmra.mxu0 %vm439_vm3, %v425_v46 }
 0x2e7   : > { %v515_v52 = vpop.f32.mrf.mxu0 }
 0x2e8   : > { %v529_v53 = vadd.f32 %v515_v52, %v404_v51 }
 0x2e9   : > { %v919_v54 = vpop.f32.mrf.mxu0 }
 0x2ea   : > { %532 = vst.msk [vmem:[#allocation2] sm:$0xff] %vm261_vm0, %v529_v53 }
 0x2eb   : > { %v520_v56 = vpop.f32.mrf.mxu0 }
 0x2ec   : > { %v530_v57 = vadd.f32 %v520_v56, %v405_v55 }
 0x2ed   : > { %v922_v58 = vpop.f32.mrf.mxu0 }
 0x2ee   : > { %533 = vst.msk [vmem:[#allocation2 + $0x8] sm:$0xff] %vm261_vm0, %v530_v57 }
 0x2ef   : > { %v525_v60 = vpop.f32.mrf.mxu0 }
 0x2f0   : > { %v531_v61 = vadd.f32 %v525_v60, %v406_v59 }
 0x2f1   : > { %v925_v62 = vpop.f32.mrf.mxu0  ;;  %v539_v63 = vld [vmem:[#allocation2] sm:$0xff] }
 0x2f2   : > { %535 = vst.msk [vmem:[#allocation2 + $0x10] sm:$0xf] %vm402_vm4, %v531_v61  ;;  %935 = vmatmul.mubr.msk.f32.vlgmr.msra.gmra.mxu1 %vm261_vm0, %v539_v63 }
 0x2f3   : > { %937 = vmatprep.mubr.msk.f32.mxu1 %vm1176_vm2, %v1175_v43 }
 0x2f5   : > { %v540_v0 = vld [vmem:[#allocation2 + $0x8] sm:$0xff] }
 0x2f6   : > { %938 = vmatmul.mubr.msk.f32.gmra.mxu1 %vm261_vm0, %v540_v0 }
 0x2f7   : > { %940 = vmatprep.mubr.msk.f32.mxu1 %vm1176_vm2, %v1175_v43 }
 0x2f9   : > { %v541_v1 = vld [vmem:[#allocation2 + $0x10] sm:$0xf] }
 0x2fa   : > { %941 = vmatmul.mubr.msk.f32.gmra.mxu1 %vm261_vm0, %v541_v1 }
 0x3b2   : > { %v621_v2 = vpop.f32.mrf.mxu1 }
 0x3b3   : > { %635 = vst.msk [vmem:[#allocation2] sm:$0xff] %vm261_vm0, %v621_v2 }
 0x3b4   : > { %v936_v3 = vpop.f32.mrf.mxu1 }
 0x3b6   : > { %v626_v4 = vpop.f32.mrf.mxu1 }
 0x3b7   : > { %636 = vst.msk [vmem:[#allocation2 + $0x8] sm:$0xff] %vm261_vm0, %v626_v4 }
 0x3b8   : > { %v939_v5 = vpop.f32.mrf.mxu1 }
 0x3ba   : > { %v631_v6 = vpop.f32.mrf.mxu1 }
 0x3bb   : > { %637 = vst.msk [vmem:[#allocation2 + $0x10] sm:$0xf] %vm402_vm4, %v631_v6 }
 0x3bc   : > { %v942_v7 = vpop.f32.mrf.mxu1 }
 0x3bd PF: > { %p868_p13 = scmp.ne.s32.totalorder %s1154_s18, 1 }
 0x3bf   : > { %641 = sbr.rel (%p868_p13) target bundleno = 1167 (0x48f), region = 56 }
 0x3c4   : > { %v644_v8 = vld [vmem:[#allocation2 + $0x10] sm:$0xf]  ;;  %vm651_vm5 = vcmask 1043456   ;;  %v643_v9 = vld [vmem:[#allocation2 + $0x8] sm:$0xff]  ;;  %949 = vmatprep.mubr.msk.f32.mxu0 %vm379_vm1, %v1350_v40  ;;  %v642_v10 = vld [vmem:[#allocation2] sm:$0xff] }
 0x3c5   : > { %943 = vmatprep.subr.msk.mxu0 %vm651_vm5, %v644_v8 }
 0x3c6   : > { %944 = vmatpush3.msk.msra.mxu0 %vm651_vm5, %v644_v8 }
 0x3c7   : > { %945 = vmatprep.subr.mxu0 %v643_v9 }
 0x3c8   : > { %946 = vmatpush3.msra.mxu0 %v643_v9 }
 0x3c9   : > { %947 = vmatprep.subr.mxu0 %v642_v10 }
 0x3ca   : > { %948 = vmatpush3.msra.mxu0 %v642_v10 }
 0x3cb   : > { %950 = vmatmul.mubr.msk.f32.vlgmr.msra.gmra.mxu0 %vm379_vm1, %v1352_v42 }
 0x48b   : > { %v951_v11 = vpop.f32.mrf.mxu0 }
 0x48c   : > { %731 = vst.msk [vmem:[%s1355_s13 + $0x8] sm:$0xff] %vm261_vm0, %v951_v11 }
 0x48d   : > { %v721_v12 = vpop.f32.mrf.mxu0 }
 0x48e   : > { %730 = vst.msk [vmem:[%s1355_s13] sm:$0xff] %vm261_vm0, %v721_v12 }
 0x48f PF: > { %s878_s18 = sshll.u32 %s1158_s19, 8  ;;  %s749_s5 = sshll.u32 %s1355_s13, 4  ;;  %s1396_s5 = int_to_ptr.vmem [resolvable:$true] %s749_s5 }
 0x490   : > { %s1393_s23 = scalar_lea.hbm %s1455_s4, %s878_s18  ;;  %s1400_s8 = scalar_lea.sflag [#allocation5], %s237_s24 }
 0x491   : > { %s1074_s9 = scalar_lea.vmem %s1396_s5, 256  ;;  %s1177_s19 = smov [#allocation6]  }
 0x492   : > { %p1075_p0 = scmp.ne.s32.totalorder %s1396_s5, %s1074_s9  ;;  %s1078_s30 = sshll.u32 %s1177_s19, 4  ;;  %s1079_s30 = int_to_ptr.vmem [resolvable:$false] %s1078_s30 }
 0x493   : > { %s1080_s10 = scalar_lea.vmem %s1079_s30, 512  ;;  %p1081_p4 = scmp.lt.s32.totalorder %s1396_s5, %s1079_s30 }
 0x494   : > { %p1076_p1 = pnand %p1075_p0, %p1255_p3  ;;  %p1082_p5 = scmp.lt.s32.totalorder %s1080_s10, %s1074_s9 }
 0x496   : > { %p1077_p2 = pneg %p1076_p1  ;;  %p1083_p6 = por %p1082_p5, %p1081_p4 }
 0x498   : > { %p1084_p7 = pnand %p1083_p6, %p1077_p2 }
 0x49a   : > { %1087 = shalt.err (!%p1084_p7)
}
 0x49b   : > { %s1088_s24 = scalar_lea.hbm %s1393_s23, 256  ;;  %s1092_s6 = scalar_lea.hbm %s1455_s4, 512 }
 0x49c   : > { %p1089_p8 = scmp.ne.s32.totalorder %s1393_s23, %s1088_s24  ;;  %p1093_p10 = scmp.lt.s32.totalorder %s1393_s23, %s1455_s4 }
 0x49d   : > { %p1094_p13 = scmp.lt.s32.totalorder %s1092_s6, %s1088_s24 }
 0x49e   : > { %p1090_p11 = pnand %p1089_p8, %p1255_p3 }
 0x49f   : > { %p1095_p0 = por %p1094_p13, %p1093_p10 }
 0x4a0   : > { %p1091_p12 = pneg %p1090_p11 }
 0x4a2   : > { %p1096_p1 = pnand %p1095_p0, %p1091_p12 }
 0x4a4   : > { %1099 = shalt.err (!%p1096_p1)
}
 0x4a5   : > { %s1178_s27 = smov 128   ;;  %s1179_s14 = smov 8  }
 0x4a6   : > { %956 = dma.vmem_to_hbm [thread:$0]  (%p1255_p3), %s1396_s5, 256, %s1393_s23, %s1400_s8, %s1178_s27, %s1178_s27, %s1179_s14  }
 0x4a7 PF: > { %p968_p2 = scmp.ge.s32.totalorder %s1170_s22, 2  ;;  %s764_s9 = sand.u32 1, %s1142_s15  }
 0x4a8   : > { %s765_s19 = scalar_lea.sflag [#allocation5], %s764_s9 }
 0x4a9   : > { %p963_p4 = pnand %p968_p2, %p1265_p9 }
 0x4ab   : > { %p964_p5 = pneg %p963_p4 }
 0x4ad   : > { %1137 = dma.done.wait (%p964_p5), %s765_s19, 256  }
 0x4ae   : > { %1139 = vsyncadd (%p964_p5), %s765_s19, 4294967040  ;;  %s18_s22 = sadd.s32 1, %s1170_s22   ;;  %s1461_s15 = smov %s1146_s16 }
 0x4af   : > { %p15_p6 = scmp.ge.s32.totalorder %s18_s22, 6   ;;  %s1462_s16 = smov %s1150_s17 }
 0x4b0   : > { %s1463_s17 = smov %s1282_s7  ;;  %s1464_s18 = smov %s1162_s20 }
 0x4b1   : > { %s1465_s19 = smov %s1166_s21  ;;  %s1466_s20 = smov %s1469_s25 }
 0x4b2   : > { %s1467_s21 = smov %s1473_s26  ;;  %17 = sbr.rel (!%p15_p6) target bundleno = 6 (0x6), region = 92 }
 0x4b7   :  { %770 = vsyncpa [#allocation4], 1 }
 0x4b8   :  { %772 = vsyncpa [#allocation4 + $0x1], 1 }
 0x4b9   :  { %773 = vsyncpa [#allocation5], 1 }
 0x4ba   :  { %775 = vsyncpa [#allocation5 + $0x1], 1 }

// kernel: tpu_custom_call.1
= control target key start
LH: loop header
LB: loop body
LE: loop exit
PB: predicated region body
PF: predicated region fallthrough
CT: control target
= control target key end

     0   :  { %9 = vsyncpa [#allocation4], 0  ;;  %s1451_s0 = inlined_call_operand.vmem [shape: f32[2,16,32], index: 0, kind: input, shape index: {}]   ;;  %s1452_s1 = inlined_call_operand.vmem [shape: f32[32,20], index: 1, kind: input, shape index: {}]   ;;  %s1453_s2 = inlined_call_operand.vmem [shape: f32[3,20], index: 2, kind: input, shape index: {}]   ;;  %s1454_s3 = inlined_call_operand.hbm [shape: f32[32,32], index: 3, kind: input, shape index: {}]   ;;  %s1455_s4 = inlined_call_operand.hbm [shape: f32[2,16,32], index: 4, kind: output, shape index: {}]  }
   0x1   :  { %10 = vsyncpa [#allocation5], 0 }
   0x2   :  { %12 = vsyncpa [#allocation5 + $0x1], 0  ;;  %s1205_s15 = smov 0   ;;  %s1207_s16 = smov 0  }
   0x3   :  { %s1209_s17 = smov 0   ;;  %s1211_s18 = smov 0  }
   0x4   :  { %s1213_s19 = smov 0   ;;  %s1215_s20 = smov 0  }
   0x5   :  { %s1217_s21 = smov 0   ;;  %s1219_s22 = smov 0  }
   0x6 LB: > { %s846_s23 = sadd.s32 4294967295, %s1170_s22   ;;  %s847_s24 = sadd.s32 4294967294, %s1170_s22   ;;  %s1170_s22 = sphi %s1219_s22, %s18_s22   ;;  %s1166_s21 = sphi %s1217_s21, %s1467_s21   ;;  %s1162_s20 = sphi %s1215_s20, %s1466_s20   ;;  %s1158_s19 = sphi %s1213_s19, %s1465_s19   ;;  %s1154_s18 = sphi %s1211_s18, %s1464_s18   ;;  %s1150_s17 = sphi %s1209_s17, %s1463_s17   ;;  %s1146_s16 = sphi %s1207_s16, %s1462_s16   ;;  %s1142_s15 = sphi %s1205_s15, %s1461_s15  }
   0x7   : > { %s33_s25 = sadd.s32 1, %s1162_s20  ;;  %s37_s26 = sadd.s32 1, %s1166_s21 }
   0x8   : > { %p35_p0 = scmp.ge.s32.totalorder %s33_s25, 2  ;;  %s139_s27 = sadd.s32 1, %s1150_s17 }
   0x9   : > { %p149_p1 = scmp.ne.s32.totalorder %s1150_s17, %s1146_s16  ;;  %p150_p2 = scmp.eq.s32.totalorder %s846_s23, 3 }
   0xa   : > { %s1469_s25 = smov (%p35_p0, %s33_s25), 0  ;;  %s1471_s26 = smov (!%p35_p0, %s37_s26), %s1166_s21 }
   0xb   : > { %p1255_p3 = por %p150_p2, %p149_p1  ;;  %p155_p4 = scmp.ne.s32.totalorder %s1146_s16, %s1142_s15 }
   0xc   : > { %p39_p5 = scmp.ge.s32.totalorder %s1471_s26, 2  ;;  %p156_p6 = scmp.eq.s32.totalorder %s847_s24, 3 }
   0xd   : > { %p848_p7 = scmp.ge.s32.totalorder %s1170_s22, 1  ;;  %p163_p8 = scmp.lt.s32.totalorder %s1170_s22, 5 }
   0xe   : > { %s1473_s26 = smov (%p39_p5, %s1471_s26), 0  ;;  %p1265_p9 = por %p156_p6, %p155_p4 }
   0xf   : > { %p1269_p10 = pnand %p848_p7, %p163_p8  ;;  %s134_s5 = ssub.s32 %s1166_s21, %s1473_s26 }
  0x10   : > { %p137_p11 = scmp.eq.s32.totalorder %s134_s5, 0  ;;  %p1277_p13 = scmp.eq.s32.totalorder %s846_s23, 0 }
  0x11   : > { %p958_p12 = pneg %p1269_p10  ;;  %s1172_s8 = smov [#allocation3]  }
  0x12   : > { %s1282_s7 = scalar_select %p137_p11, %s1150_s17, %s139_s27  }
  0x13   : > { %s181_s9 = sshll.u32 %s1172_s8, 4  ;;  %p1286_p0 = pnand %p1277_p13, %p958_p12  ;;  %s182_s9 = int_to_ptr.vmem [resolvable:$true] %s181_s9 }
  0x14   : > { %s1059_s11 = scalar_lea.vmem %s182_s9, 512  ;;  %p1067_p6 = scmp.lt.s32.totalorder %s182_s9, %s182_s9 }
  0x15   : > { %p1050_p1 = pneg %p1286_p0  ;;  %p1060_p2 = scmp.ne.s32.totalorder %s182_s9, %s1059_s11 }
  0x16   : > { %p1068_p7 = scmp.lt.s32.totalorder %s1059_s11, %s1059_s11 }
  0x17   : > { %p1062_p4 = pnand %p1060_p2, %p1050_p1 }
  0x18   : > { %p1069_p8 = por %p1068_p7, %p1067_p6 }
  0x19   : > { %p1063_p5 = pneg %p1062_p4 }
  0x1b   : > { %p1070_p11 = pnand %p1069_p8, %p1063_p5 }
  0x1d   : > { %1073 = shalt.err (!%p1070_p11)
}
  0x1e   : > { %s1173_s12 = smov 128   ;;  %s1174_s13 = smov 8  }
  0x1f   : > { %961 = dma.hbm_to_vmem [thread:$0]  (!%p1286_p0), %s1454_s3, 512, %s182_s9, [#allocation4], %s1173_s12, %s1173_s12, %s1174_s13  }
  0x20   : > { %210 = sbr.rel (%p1269_p10) target bundleno = 1191 (0x4a7), region = 36 }
  0x25   : > { %1133 = dma.done.wait (%p1277_p13), [#allocation4], 512  }
  0x26   : > { %1135 = vsyncadd (%p1277_p13), [#allocation4], 4294966784  ;;  %s237_s24 = sand.u32 1, %s1146_s16   ;;  %p241_p12 = scmp.lt.s32.totalorder %s1158_s19, 1  ;;  %vm261_vm0 = vcmask 261120   ;;  %v260_v0 = vld [vmem:[%s1452_s1 + $0x18] sm:$0xff] }
  0x27   : > { %s1307_s27 = sshll.u32 %s237_s24, 4  ;;  %v259_v1 = vld [vmem:[%s1452_s1 + $0x10] sm:$0xff]  ;;  %902 = vmatprep.subr.mxu0 %v260_v0  ;;  %v258_v4 = vld [vmem:[%s1452_s1 + $0x8] sm:$0xff]  ;;  %v257_v7 = vld [vmem:[%s1452_s1] sm:$0xff]  ;;  %vm379_vm1 = vcmask 162816   ;;  %p861_p10 = scmp.ne.s32.totalorder %s1154_s18, 0 }
  0x28   : > { %s242_s5 = scalar_select %p241_p12, %s1158_s19, 1  ;;  %903 = vmatpush3.msra.mxu0 %v260_v0  ;;  %v858_v11 = vld [vmem:[%s1453_s2] ss:$0 sm:$0xff]  ;;  %v859_v14 = vld [vmem:[%s1453_s2 + $0x1] ss:$0 sm:$0xff] }
  0x29   : > { %904 = vmatprep.subr.mxu0 %v259_v1  ;;  %v860_v30 = vld [vmem:[%s1453_s2 + $0x2] ss:$0 sm:$0xff]  ;;  %s1355_s13 = scalar_lea.vmem [#allocation6], %s1307_s27 }
  0x2a   : > { %s877_s8 = sshll.u32 %s242_s5, 4  ;;  %905 = vmatpush3.msra.mxu0 %v259_v1 }
  0x2b   : > { %s248_s10 = scalar_lea.vmem %s1451_s0, %s877_s8  ;;  %906 = vmatprep.subr.mxu0 %v258_v4 }
  0x2c   : > { %v1319_v2 = vld [vmem:[%s248_s10] sm:$0xff]  ;;  %v1321_v3 = vld [vmem:[%s248_s10 + $0x8] sm:$0xff]  ;;  %907 = vmatpush3.msra.mxu0 %v258_v4 }
  0x2d   : > { %910 = vmatprep.mubr.msk.f32.mxu0 %vm261_vm0, %v1319_v2  ;;  %v343_v5 = vmul.f32 %v1319_v2, %v1319_v2  ;;  %v344_v6 = vmul.f32 %v1321_v3, %v1321_v3  ;;  %908 = vmatprep.subr.mxu0 %v257_v7 }
  0x2e   : > { %909 = vmatpush3.msra.mxu0 %v257_v7 }
  0x2f   : > { %v345_v8 = vsel %vm261_vm0, %v343_v5, 0.0  ;;  %v348_v9 = vsel %vm261_vm0, %v344_v6, 0.0  ;;  %911 = vmatmul.mubr.msk.f32.vlgmr.msra.gmra.mxu0 %vm261_vm0, %v1321_v3 }
  0x30   : > { %346 = vadd.xlane.f32.xlu0 %v345_v8 }
  0x34   : > { %349 = vadd.xlane.f32.xlu0 %v348_v9 }
  0xb9   : > { %v347_v10 = vpop.xlane.xlu0 %346 }
  0xba   : > { %v355_v15 = vmul.f32 %v858_v11, %v347_v10 }
  0xbc   : > { %v361_v17 = vadd.f32 %v859_v14, %v355_v15 }
  0xbd   : > { %v350_v12 = vpop.xlane.xlu0 %349 }
  0xbe   : > { %v356_v13 = vmul.f32 %v858_v11, %v350_v12 }
  0xc0   : > { %v362_v16 = vadd.f32 %v859_v14, %v356_v13 }
  0xef   : > { %v912_v18 = vpop.f32.mrf.mxu0 }
  0xf0   : > { %v364_v19 = vadd.f32 %v912_v18, %v362_v16 }
  0xf1   : > { %v334_v20 = vpop.f32.mrf.mxu0 }
  0xf2   : > { %v366_v21 = vmin.f32 %v364_v19, 0.0  ;;  %v363_v22 = vadd.f32 %v361_v17, %v334_v20 }
  0xf4   : > { %v368_v23 = vmax.f32 %v366_v21, -12.5  ;;  %v365_v24 = vmin.f32 %v363_v22, 0.0 }
  0xf6   : > { %v371_v25 = vmul.f32 1.442695, %v368_v23  ;;  %v367_v26 = vmax.f32 %v365_v24, -12.5 }
  0xf8   : > { %v369_v27 = vmul.f32 1.442695, %v367_v26  ;;  %1040 = vpow2.f32 %v371_v25 }
  0xfa   : > { %1042 = vpow2.f32 %v369_v27 }
 0x105   : > { %v1041_v28 = vpop.eup %1040 }
 0x106   : > { %v378_v33 = vmul.f32 %v1041_v28, %v860_v30 }
 0x107   : > { %v1043_v29 = vpop.eup %1042 }
 0x108   : > { %v377_v31 = vmul.f32 %v1043_v29, %v860_v30  ;;  %v383_v34 = vsel %vm379_vm1, %v378_v33, 0.0 }
 0x10a   : > { %v380_v32 = vsel %vm379_vm1, %v377_v31, 0.0 }
 0x10b   : > { %381 = vadd.xlane.f32.xlu1 %v380_v32 }
 0x10f   : > { %384 = vadd.xlane.f32.xlu1 %v383_v34 }
 0x194   : > { %v382_v35 = vpop.xlane.xlu1 %381 }
 0x195   : > { %v386_v36 = vmax.f32 %v382_v35, 1e-08 }
 0x197   : > { %1044 = vrcp.f32 %v386_v36 }
 0x198   : > { %v385_v37 = vpop.xlane.xlu1 %384 }
 0x199   : > { %v387_v38 = vmax.f32 %v385_v37, 1e-08 }
 0x19b   : > { %1046 = vrcp.f32 %v387_v38 }
 0x1a4   : > { %v1045_v39 = vpop.eup %1044 }
 0x1a5   : > { %v1350_v40 = vmul.f32 %v1045_v39, %v377_v31  ;;  %395 = sbr.rel (%p861_p10) target bundleno = 957 (0x3bd), region = 44 }
 0x1a8   : > { %v1047_v41 = vpop.eup %1046 }
 0x1a9   : > { %v1352_v42 = vmul.f32 %v1047_v41, %v378_v33 }
 0x1aa   : > { %407 = vxpose.xlu0.b32.start [1/2] (short) (narrow) %v1350_v40, 24  ;;  %v1175_v43 = vmov 0.0   ;;  %vm1176_vm2 = vmmov 0   ;;  %vm439_vm3 = vcmask 130048   ;;  %vm402_vm4 = vcmask 257024   ;;  %v545_v47 = vld [vmem:[#allocation3 + $0x18] sm:$0xff] }
 0x1ab   : > { %913 = vmatprep.subr.mxu0 %v1175_v43  ;;  %400 = vst.msk [vmem:[#allocation2] sm:$0xff] %vm261_vm0, %v1175_v43  ;;  %401 = vst.msk [vmem:[#allocation2 + $0x8] sm:$0xff] %vm261_vm0, %v1175_v43  ;;  %917 = vmatprep.mubr.msk.f32.mxu0 %vm1176_vm2, %v1175_v43  ;;  %v544_v48 = vld [vmem:[#allocation3 + $0x10] sm:$0xff]  ;;  %v543_v49 = vld [vmem:[#allocation3 + $0x8] sm:$0xff] }
 0x1ac   : > { %914 = vmatpush3.msra.mxu0 %v1321_v3  ;;  %926 = vmatprep.subr.mxu1 %v1175_v43  ;;  %403 = vst.msk [vmem:[#allocation2 + $0x10] sm:$0xf] %vm402_vm4, %v1175_v43  ;;  %v542_v50 = vld [vmem:[#allocation3] sm:$0xff] }
 0x1ad   : > { %915 = vmatprep.subr.mxu0 %v1175_v43  ;;  %934 = vmatprep.mubr.msk.f32.mxu1 %vm1176_vm2, %v1175_v43 }
 0x1ae   : > { %408 = vxpose.xlu0.b32.end [2/2] (short) (narrow) %v1352_v42, 24  ;;  %916 = vmatpush3.msra.mxu0 %v1319_v2 }
 0x1af   : > { %927 = vmatpush3.msra.mxu1 %v545_v47 }
 0x1b0   : > { %928 = vmatprep.subr.mxu1 %v1175_v43 }
 0x1b1   : > { %929 = vmatpush3.msra.mxu1 %v544_v48 }
 0x1b2   : > { %930 = vmatprep.subr.mxu1 %v1175_v43  ;;  %v404_v51 = vld [vmem:[#allocation2] sm:$0xff]  ;;  %v405_v55 = vld [vmem:[#allocation2 + $0x8] sm:$0xff] }
 0x1b3   : > { %931 = vmatpush3.msra.mxu1 %v543_v49  ;;  %v406_v59 = vld [vmem:[#allocation2 + $0x10] sm:$0xf] }
 0x1b4   : > { %932 = vmatprep.subr.mxu1 %v1175_v43 }
 0x1b5   : > { %933 = vmatpush3.msra.mxu1 %v542_v50 }
 0x226   : > { %v423_v44 = vpop.trf.xlu0 }
 0x227   : > { %918 = vmatmul.mubr.msk.f32.vlgmr.msra.gmra.mxu0 %vm439_vm3, %v423_v44 }
 0x228   : > { %920 = vmatprep.mubr.msk.f32.mxu0 %vm1176_vm2, %v1175_v43 }
 0x22a   : > { %v424_v45 = vpop.trf.xlu0 }
 0x22b   : > { %921 = vmatmul.mubr.msk.f32.gmra.mxu0 %vm439_vm3, %v424_v45 }
 0x22c   : > { %923 = vmatprep.mubr.msk.f32.mxu0 %vm1176_vm2, %v1175_v43 }
 0x22e   : > { %v425_v46 = vpop.trf.xlu0 }
 0x22f   : > { %924 = vmatmul.mubr.msk.f32.gmra.mxu0 %vm439_vm3, %v425_v46 }
 0x2e7   : > { %v515_v52 = vpop.f32.mrf.mxu0 }
 0x2e8   : > { %v529_v53 = vadd.f32 %v515_v52, %v404_v51 }
 0x2e9   : > { %v919_v54 = vpop.f32.mrf.mxu0 }
 0x2ea   : > { %532 = vst.msk [vmem:[#allocation2] sm:$0xff] %vm261_vm0, %v529_v53 }
 0x2eb   : > { %v520_v56 = vpop.f32.mrf.mxu0 }
 0x2ec   : > { %v530_v57 = vadd.f32 %v520_v56, %v405_v55 }
 0x2ed   : > { %v922_v58 = vpop.f32.mrf.mxu0 }
 0x2ee   : > { %533 = vst.msk [vmem:[#allocation2 + $0x8] sm:$0xff] %vm261_vm0, %v530_v57 }
 0x2ef   : > { %v525_v60 = vpop.f32.mrf.mxu0 }
 0x2f0   : > { %v531_v61 = vadd.f32 %v525_v60, %v406_v59 }
 0x2f1   : > { %v925_v62 = vpop.f32.mrf.mxu0  ;;  %v539_v63 = vld [vmem:[#allocation2] sm:$0xff] }
 0x2f2   : > { %535 = vst.msk [vmem:[#allocation2 + $0x10] sm:$0xf] %vm402_vm4, %v531_v61  ;;  %935 = vmatmul.mubr.msk.f32.vlgmr.msra.gmra.mxu1 %vm261_vm0, %v539_v63 }
 0x2f3   : > { %937 = vmatprep.mubr.msk.f32.mxu1 %vm1176_vm2, %v1175_v43 }
 0x2f5   : > { %v540_v0 = vld [vmem:[#allocation2 + $0x8] sm:$0xff] }
 0x2f6   : > { %938 = vmatmul.mubr.msk.f32.gmra.mxu1 %vm261_vm0, %v540_v0 }
 0x2f7   : > { %940 = vmatprep.mubr.msk.f32.mxu1 %vm1176_vm2, %v1175_v43 }
 0x2f9   : > { %v541_v1 = vld [vmem:[#allocation2 + $0x10] sm:$0xf] }
 0x2fa   : > { %941 = vmatmul.mubr.msk.f32.gmra.mxu1 %vm261_vm0, %v541_v1 }
 0x3b2   : > { %v621_v2 = vpop.f32.mrf.mxu1 }
 0x3b3   : > { %635 = vst.msk [vmem:[#allocation2] sm:$0xff] %vm261_vm0, %v621_v2 }
 0x3b4   : > { %v936_v3 = vpop.f32.mrf.mxu1 }
 0x3b6   : > { %v626_v4 = vpop.f32.mrf.mxu1 }
 0x3b7   : > { %636 = vst.msk [vmem:[#allocation2 + $0x8] sm:$0xff] %vm261_vm0, %v626_v4 }
 0x3b8   : > { %v939_v5 = vpop.f32.mrf.mxu1 }
 0x3ba   : > { %v631_v6 = vpop.f32.mrf.mxu1 }
 0x3bb   : > { %637 = vst.msk [vmem:[#allocation2 + $0x10] sm:$0xf] %vm402_vm4, %v631_v6 }
 0x3bc   : > { %v942_v7 = vpop.f32.mrf.mxu1 }
 0x3bd PF: > { %p868_p13 = scmp.ne.s32.totalorder %s1154_s18, 1 }
 0x3bf   : > { %641 = sbr.rel (%p868_p13) target bundleno = 1167 (0x48f), region = 56 }
 0x3c4   : > { %v644_v8 = vld [vmem:[#allocation2 + $0x10] sm:$0xf]  ;;  %vm651_vm5 = vcmask 1043456   ;;  %v643_v9 = vld [vmem:[#allocation2 + $0x8] sm:$0xff]  ;;  %949 = vmatprep.mubr.msk.f32.mxu0 %vm379_vm1, %v1350_v40  ;;  %v642_v10 = vld [vmem:[#allocation2] sm:$0xff] }
 0x3c5   : > { %943 = vmatprep.subr.msk.mxu0 %vm651_vm5, %v644_v8 }
 0x3c6   : > { %944 = vmatpush3.msk.msra.mxu0 %vm651_vm5, %v644_v8 }
 0x3c7   : > { %945 = vmatprep.subr.mxu0 %v643_v9 }
 0x3c8   : > { %946 = vmatpush3.msra.mxu0 %v643_v9 }
 0x3c9   : > { %947 = vmatprep.subr.mxu0 %v642_v10 }
 0x3ca   : > { %948 = vmatpush3.msra.mxu0 %v642_v10 }
 0x3cb   : > { %950 = vmatmul.mubr.msk.f32.vlgmr.msra.gmra.mxu0 %vm379_vm1, %v1352_v42 }
 0x48b   : > { %v951_v11 = vpop.f32.mrf.mxu0 }
 0x48c   : > { %731 = vst.msk [vmem:[%s1355_s13 + $0x8] sm:$0xff] %vm261_vm0, %v951_v11 }
 0x48d   : > { %v721_v12 = vpop.f32.mrf.mxu0 }
 0x48e   : > { %730 = vst.msk [vmem:[%s1355_s13] sm:$0xff] %vm261_vm0, %v721_v12 }
 0x48f PF: > { %s878_s18 = sshll.u32 %s1158_s19, 8  ;;  %s749_s5 = sshll.u32 %s1355_s13, 4  ;;  %s1396_s5 = int_to_ptr.vmem [resolvable:$true] %s749_s5 }
 0x490   : > { %s1393_s23 = scalar_lea.hbm %s1455_s4, %s878_s18  ;;  %s1400_s8 = scalar_lea.sflag [#allocation5], %s237_s24 }
 0x491   : > { %s1074_s9 = scalar_lea.vmem %s1396_s5, 256  ;;  %s1177_s19 = smov [#allocation6]  }
 0x492   : > { %p1075_p0 = scmp.ne.s32.totalorder %s1396_s5, %s1074_s9  ;;  %s1078_s30 = sshll.u32 %s1177_s19, 4  ;;  %s1079_s30 = int_to_ptr.vmem [resolvable:$false] %s1078_s30 }
 0x493   : > { %s1080_s10 = scalar_lea.vmem %s1079_s30, 512  ;;  %p1081_p4 = scmp.lt.s32.totalorder %s1396_s5, %s1079_s30 }
 0x494   : > { %p1076_p1 = pnand %p1075_p0, %p1255_p3  ;;  %p1082_p5 = scmp.lt.s32.totalorder %s1080_s10, %s1074_s9 }
 0x496   : > { %p1077_p2 = pneg %p1076_p1  ;;  %p1083_p6 = por %p1082_p5, %p1081_p4 }
 0x498   : > { %p1084_p7 = pnand %p1083_p6, %p1077_p2 }
 0x49a   : > { %1087 = shalt.err (!%p1084_p7)
}
 0x49b   : > { %s1088_s24 = scalar_lea.hbm %s1393_s23, 256  ;;  %s1092_s6 = scalar_lea.hbm %s1455_s4, 512 }
 0x49c   : > { %p1089_p8 = scmp.ne.s32.totalorder %s1393_s23, %s1088_s24  ;;  %p1093_p10 = scmp.lt.s32.totalorder %s1393_s23, %s1455_s4 }
 0x49d   : > { %p1094_p13 = scmp.lt.s32.totalorder %s1092_s6, %s1088_s24 }
 0x49e   : > { %p1090_p11 = pnand %p1089_p8, %p1255_p3 }
 0x49f   : > { %p1095_p0 = por %p1094_p13, %p1093_p10 }
 0x4a0   : > { %p1091_p12 = pneg %p1090_p11 }
 0x4a2   : > { %p1096_p1 = pnand %p1095_p0, %p1091_p12 }
 0x4a4   : > { %1099 = shalt.err (!%p1096_p1)
}
 0x4a5   : > { %s1178_s27 = smov 128   ;;  %s1179_s14 = smov 8  }
 0x4a6   : > { %956 = dma.vmem_to_hbm [thread:$0]  (%p1255_p3), %s1396_s5, 256, %s1393_s23, %s1400_s8, %s1178_s27, %s1178_s27, %s1179_s14  }
 0x4a7 PF: > { %p968_p2 = scmp.ge.s32.totalorder %s1170_s22, 2  ;;  %s764_s9 = sand.u32 1, %s1142_s15  }
 0x4a8   : > { %s765_s19 = scalar_lea.sflag [#allocation5], %s764_s9 }
 0x4a9   : > { %p963_p4 = pnand %p968_p2, %p1265_p9 }
 0x4ab   : > { %p964_p5 = pneg %p963_p4 }
 0x4ad   : > { %1137 = dma.done.wait (%p964_p5), %s765_s19, 256  }
 0x4ae   : > { %1139 = vsyncadd (%p964_p5), %s765_s19, 4294967040  ;;  %s18_s22 = sadd.s32 1, %s1170_s22   ;;  %s1461_s15 = smov %s1146_s16 }
 0x4af   : > { %p15_p6 = scmp.ge.s32.totalorder %s18_s22, 6   ;;  %s1462_s16 = smov %s1150_s17 }
 0x4b0   : > { %s1463_s17 = smov %s1282_s7  ;;  %s1464_s18 = smov %s1162_s20 }
 0x4b1   : > { %s1465_s19 = smov %s1166_s21  ;;  %s1466_s20 = smov %s1469_s25 }
 0x4b2   : > { %s1467_s21 = smov %s1473_s26  ;;  %17 = sbr.rel (!%p15_p6) target bundleno = 6 (0x6), region = 92 }
 0x4b7   :  { %770 = vsyncpa [#allocation4], 1 }
 0x4b8   :  { %772 = vsyncpa [#allocation4 + $0x1], 1 }
 0x4b9   :  { %773 = vsyncpa [#allocation5], 1 }
 0x4ba   :  { %775 = vsyncpa [#allocation5 + $0x1], 1 }

</bundles_post_ra>
